<compile_context>
chip_gen: v7x
topology: tpu7x:2x2x1
jax: 0.10.0
libtpu: 0.0.40
codegen_flags: <defaults>
</compile_context>

<pallas_src>
import functools

import jax
import jax.numpy as jnp
from jax import lax
from jax.experimental import pallas as pl
from jax.experimental.pallas import tpu as pltpu

# ---- hyperparameters (deterministic, from the module's __init__ defaults) ----
T = 8                        # time_step
LEVEL = 8                    # kwargs 'level'
STEP = LEVEL // 2 - 1        # = 3
THETA = 1.0                  # ST-BIF threshold (MyQuan scale s); power of two -> exact f32
POS_MAX = LEVEL // 2 - 1     # = 3   (symmetric quantization)
NEG_MIN = -(LEVEL // 2)      # = -4

# ---- shapes ----
B, C, H, W = 2, 4, 16, 16
F_OUT = 8                    # conv output channels
K = 16                       # classifier classes
HW = H * W                   # 256 pixels per image -> lane axis (2 lane tiles)
PACK_COLS = max(C, K)        # packed-weight buffer width


# ---------------------------------------------------------------------------
# ST-BIF neuron: final spike counters after T steps of constant drive `pre`.
# ---------------------------------------------------------------------------
def _stbif_counts_closed_form(pre):
    # With constant per-step drive and v0 = 0.5*THETA, the T-step ST-BIF loop is a
    # deterministic quantizer:  cnt = clip(floor(T*pre/THETA + 0.5), NEG_MIN, POS_MAX).
    # Exactly equivalent to the loop whenever T >= POS_MAX and T >= -NEG_MIN (8 >= 3, 8 >= 4).
    u = pre * (T / THETA) + 0.5
    return jnp.clip(jnp.floor(u), float(NEG_MIN), float(POS_MAX))


def _stbif_counts_loop(pre):
    # Explicit per-step dynamics (validation path).
    v0 = jnp.full(pre.shape, 0.5 * THETA, dtype=jnp.float32)
    c0 = jnp.zeros(pre.shape, dtype=jnp.float32)

    def step(_, carry):
        v, cnt = carry
        v = v + pre
        pos = jnp.logical_and(v >= THETA, cnt < float(POS_MAX))
        neg = jnp.logical_and(v < 0.0, cnt > float(NEG_MIN))
        spike = jnp.where(pos, 1.0, jnp.where(neg, -1.0, 0.0))   # fused select
        return v - spike * THETA, cnt + spike

    _, cnt = lax.fori_loop(0, T, step, (v0, c0), unroll=True)
    return cnt


# ---------------------------------------------------------------------------
# Fused kernel: encode + conv1x1 + ST-BIF (T steps) + avg-pool + fc + sum over T.
# ---------------------------------------------------------------------------
def snn_ms_kernel(x_ref, w_ref, out_ref, *, closed_form):
    """Whole SNN forward in one gridless invocation.

    x_ref  : (B*C, HW)            raw NCHW pixels (row-major view; row b*C+c = image b, chan c)
    w_ref  : (2*F_OUT, PACK_COLS) packed weights:
               rows [0, F_OUT)  cols [0, C) : conv weight with 1/STEP folded in
               rows [F_OUT, 2F) cols [0, K) : fc weight (transposed) with THETA/HW folded in
    out_ref: (B, K)               logits, written once
    """
    x = x_ref[...]
    w = w_ref[...]
    wc = w[0:F_OUT, 0:C]                      # (F_OUT, C)
    wf = w[F_OUT:2 * F_OUT, 0:K]              # (F_OUT, K)

    out_rows = []
    for b in range(B):                        # static unroll over the 2 images
        # 1x1 conv on the (x/STEP) encoded input as 4 VPU broadcast-FMAs (no MXU).
        pre = jnp.zeros((F_OUT, HW), dtype=jnp.float32)
        for c in range(C):
            pre = pre + wc[:, c:c + 1] * x[b * C + c:b * C + c + 1, :]

        # ST-BIF neuron over T steps -> final spike counters (integers in [NEG_MIN, POS_MAX]).
        cnt = _stbif_counts_closed_form(pre) if closed_form else _stbif_counts_loop(pre)

        # Linearity of (pool -> fc -> sum over t): sum_t spike_t == cnt, so the global average
        # pool and the classifier head run exactly once.  THETA/HW is folded into wf.
        pooled = jnp.sum(cnt, axis=1, keepdims=True)                     # (F_OUT, 1)
        out_rows.append(jnp.sum(pooled * wf, axis=0, keepdims=True))     # (1, K)

    out_ref[...] = jnp.concatenate(out_rows, axis=0)                     # (B, K)


# ---------------------------------------------------------------------------
# Host-side one-time model prep (constant per model, mirrors _replace_weight).
# ---------------------------------------------------------------------------
def prepare_params(conv_w, fc_w):
    """conv_w: (F_OUT, C, 1, 1) Conv2d weight; fc_w: (K, F_OUT) Linear weight."""
    wc_eff = (conv_w.reshape(F_OUT, C) / STEP).astype(jnp.float32)   # fold analog-encoding 1/step
    wf_eff = (fc_w.T * (THETA / HW)).astype(jnp.float32)             # fold neuron scale & pool 1/HW
    packed = jnp.zeros((2 * F_OUT, PACK_COLS), dtype=jnp.float32)
    packed = packed.at[0:F_OUT, 0:C].set(wc_eff)
    packed = packed.at[F_OUT:, 0:K].set(wf_eff)
    return packed


def make_forward(closed_form=True):
    kern = functools.partial(snn_ms_kernel, closed_form=closed_form)

    @jax.jit
    def forward(x_nchw, packed_w):
        # Zero-copy row-major view (no transpose, no data movement): (B,C,H,W) -> (B*C, H*W).
        x2 = x_nchw.reshape(B * C, HW)
        return pl.pallas_call(
            kern,
            out_shape=jax.ShapeDtypeStruct((B, K), jnp.float32),
            in_specs=[
                pl.BlockSpec(memory_space=pltpu.MemorySpace.VMEM),   # x  (B*C, HW)
                pl.BlockSpec(memory_space=pltpu.MemorySpace.VMEM),   # packed weights (16, 16)
            ],
            out_specs=pl.BlockSpec(memory_space=pltpu.MemorySpace.VMEM),
        )(x2, packed_w)

    return forward


# ---------------------------------------------------------------------------
# Pure-JAX reference of the module semantics (per-step loop, un-fused).
# ---------------------------------------------------------------------------
def reference_forward(x_nchw, conv_w, fc_w):
    wc = conv_w.reshape(F_OUT, C).astype(jnp.float32)    # (F_OUT, C)
    wf = fc_w.astype(jnp.float32)                        # (K, F_OUT)
    x_enc = (x_nchw / STEP).astype(jnp.float32)          # analog encoding, same every step

    # exact f32 1x1 conv (explicit channel loop, no matmul-precision dependence)
    pre = jnp.zeros((B, F_OUT, H, W), dtype=jnp.float32)
    for c in range(C):
        pre = pre + wc[:, c][None, :, None, None] * x_enc[:, c][:, None, :, :]

    v = jnp.full(pre.shape, 0.5 * THETA, dtype=jnp.float32)
    cnt = jnp.zeros(pre.shape, dtype=jnp.float32)
    out = jnp.zeros((B, K), dtype=jnp.float32)
    for _ in range(T):
        v = v + pre
        pos = (v >= THETA) & (cnt < POS_MAX)
        neg = (v < 0.0) & (cnt > NEG_MIN)
        spike = jnp.where(pos, 1.0, 0.0) - jnp.where(neg, 1.0, 0.0)
        cnt = cnt + spike
        v = v - spike * THETA
        s = spike * THETA                                 # neuron output; ReLU -> Identity
        pooled = jnp.mean(s, axis=(2, 3))                 # global average pool (B, F_OUT)
        out = out + jnp.dot(pooled, wf.T, precision=lax.Precision.HIGHEST)
    return out


if __name__ == "__main__":
    key = jax.random.PRNGKey(0)
    kx, kc, kf = jax.random.split(key, 3)

    # Inputs / conv weights are quantized to multiples of 1/32 and pre-multiplied by STEP so
    # that x/STEP, conv_w/STEP and the 1x1-conv pre-activation are *exact* in f32.  Spike
    # decisions (v >= theta, v < 0) are discontinuous, so this keeps the kernel and the
    # reference on the same side of every threshold (bitwise-stable comparison).
    q_x = jnp.round(16.0 * jax.random.normal(kx, (B, C, H, W), dtype=jnp.float32)) / 32.0
    x = (STEP * q_x).astype(jnp.float32)

    q_w = jnp.round(8.0 * jax.random.normal(kc, (F_OUT, C, 1, 1), dtype=jnp.float32)) / 32.0
    conv_w = (STEP * q_w).astype(jnp.float32)             # Conv2d(C, F_OUT, 1, bias=False) weight
    fc_w = 0.5 * jax.random.normal(kf, (K, F_OUT), dtype=jnp.float32)   # Linear(F_OUT, K) weight

    packed_w = prepare_params(conv_w, fc_w)               # one-time model prep (constants)

    fwd = make_forward(closed_form=True)
    out = jax.block_until_ready(fwd(x, packed_w))
    assert out.shape == (B, K)

    ref = reference_forward(x, conv_w, fc_w)
    assert jnp.allclose(out, ref, atol=1e-5, rtol=1e-5), (out, ref)

    # Validate the closed-form ST-BIF collapse against the explicit per-step loop kernel.
    out_loop = jax.block_until_ready(make_forward(closed_form=False)(x, packed_w))
    assert jnp.allclose(out, out_loop, atol=1e-6, rtol=0.0), (out, out_loop)

    print("KERNEL_OK")
</pallas_src>

<mosaic_0001>
module attributes {stable_mosaic.version = 11 : i64} {
  func.func @snn_ms_kernel(%arg0: memref<8x256xf32, #tpu.memory_space<vmem>>, %arg1: memref<16x16xf32, #tpu.memory_space<vmem>>, %arg2: memref<2x16xf32, #tpu.memory_space<vmem>>) attributes {dimension_semantics = [], scalar_prefetch = 0 : i64, scratch_operands = 0 : i64, tpu.core_type = #tpu.core_type<tc>} {
    %c0 = arith.constant 0 : index
    %c0_0 = arith.constant 0 : index
    %0 = vector.load %arg0[%c0, %c0_0] : memref<8x256xf32, #tpu.memory_space<vmem>>, vector<8x256xf32>
    %c0_1 = arith.constant 0 : index
    %c0_2 = arith.constant 0 : index
    %1 = vector.load %arg1[%c0_1, %c0_2] : memref<16x16xf32, #tpu.memory_space<vmem>>, vector<16x16xf32>
    %2 = vector.extract_strided_slice %1 {offsets = [0, 0], sizes = [8, 4], strides = [1, 1]} : vector<16x16xf32> to vector<8x4xf32>
    %3 = vector.extract_strided_slice %1 {offsets = [8, 0], sizes = [8, 16], strides = [1, 1]} : vector<16x16xf32> to vector<8x16xf32>
    %cst = arith.constant 0.000000e+00 : f32
    %4 = vector.broadcast %cst : f32 to vector<8x256xf32>
    %5 = vector.extract_strided_slice %2 {offsets = [0, 0], sizes = [8, 1], strides = [1, 1]} : vector<8x4xf32> to vector<8x1xf32>
    %6 = vector.extract_strided_slice %0 {offsets = [0, 0], sizes = [1, 256], strides = [1, 1]} : vector<8x256xf32> to vector<1x256xf32>
    %7 = vector.broadcast %5 : vector<8x1xf32> to vector<8x256xf32>
    %8 = vector.broadcast %6 : vector<1x256xf32> to vector<8x256xf32>
    %9 = arith.mulf %7, %8 : vector<8x256xf32>
    %10 = arith.addf %4, %9 : vector<8x256xf32>
    %11 = vector.extract_strided_slice %2 {offsets = [0, 1], sizes = [8, 1], strides = [1, 1]} : vector<8x4xf32> to vector<8x1xf32>
    %12 = vector.extract_strided_slice %0 {offsets = [1, 0], sizes = [1, 256], strides = [1, 1]} : vector<8x256xf32> to vector<1x256xf32>
    %13 = vector.broadcast %11 : vector<8x1xf32> to vector<8x256xf32>
    %14 = vector.broadcast %12 : vector<1x256xf32> to vector<8x256xf32>
    %15 = arith.mulf %13, %14 : vector<8x256xf32>
    %16 = arith.addf %10, %15 : vector<8x256xf32>
    %17 = vector.extract_strided_slice %2 {offsets = [0, 2], sizes = [8, 1], strides = [1, 1]} : vector<8x4xf32> to vector<8x1xf32>
    %18 = vector.extract_strided_slice %0 {offsets = [2, 0], sizes = [1, 256], strides = [1, 1]} : vector<8x256xf32> to vector<1x256xf32>
    %19 = vector.broadcast %17 : vector<8x1xf32> to vector<8x256xf32>
    %20 = vector.broadcast %18 : vector<1x256xf32> to vector<8x256xf32>
    %21 = arith.mulf %19, %20 : vector<8x256xf32>
    %22 = arith.addf %16, %21 : vector<8x256xf32>
    %23 = vector.extract_strided_slice %2 {offsets = [0, 3], sizes = [8, 1], strides = [1, 1]} : vector<8x4xf32> to vector<8x1xf32>
    %24 = vector.extract_strided_slice %0 {offsets = [3, 0], sizes = [1, 256], strides = [1, 1]} : vector<8x256xf32> to vector<1x256xf32>
    %25 = vector.broadcast %23 : vector<8x1xf32> to vector<8x256xf32>
    %26 = vector.broadcast %24 : vector<1x256xf32> to vector<8x256xf32>
    %27 = arith.mulf %25, %26 : vector<8x256xf32>
    %28 = arith.addf %22, %27 : vector<8x256xf32>
    %cst_3 = arith.constant 8.000000e+00 : f32
    %29 = vector.broadcast %cst_3 : f32 to vector<8x256xf32>
    %30 = arith.mulf %28, %29 : vector<8x256xf32>
    %cst_4 = arith.constant 5.000000e-01 : f32
    %31 = vector.broadcast %cst_4 : f32 to vector<8x256xf32>
    %32 = arith.addf %30, %31 : vector<8x256xf32>
    %33 = math.floor %32 : vector<8x256xf32>
    %cst_5 = arith.constant -4.000000e+00 : f32
    %cst_6 = arith.constant 3.000000e+00 : f32
    %34 = vector.broadcast %cst_5 : f32 to vector<8x256xf32>
    %35 = arith.maximumf %34, %33 : vector<8x256xf32>
    %36 = vector.broadcast %cst_6 : f32 to vector<8x256xf32>
    %37 = arith.minimumf %36, %35 : vector<8x256xf32>
    %cst_7 = arith.constant dense<0.000000e+00> : vector<8xf32>
    %38 = vector.multi_reduction <add>, %37, %cst_7 [1] : vector<8x256xf32> to vector<8xf32>
    %39 = vector.shape_cast %38 : vector<8xf32> to vector<8x1xf32>
    %40 = vector.broadcast %39 : vector<8x1xf32> to vector<8x16xf32>
    %41 = arith.mulf %40, %3 : vector<8x16xf32>
    %cst_8 = arith.constant dense<0.000000e+00> : vector<16xf32>
    %42 = vector.multi_reduction <add>, %41, %cst_8 [0] : vector<8x16xf32> to vector<16xf32>
    %43 = vector.shape_cast %42 : vector<16xf32> to vector<1x16xf32>
    %cst_9 = arith.constant 0.000000e+00 : f32
    %44 = vector.broadcast %cst_9 : f32 to vector<8x256xf32>
    %45 = vector.extract_strided_slice %2 {offsets = [0, 0], sizes = [8, 1], strides = [1, 1]} : vector<8x4xf32> to vector<8x1xf32>
    %46 = vector.extract_strided_slice %0 {offsets = [4, 0], sizes = [1, 256], strides = [1, 1]} : vector<8x256xf32> to vector<1x256xf32>
    %47 = vector.broadcast %45 : vector<8x1xf32> to vector<8x256xf32>
    %48 = vector.broadcast %46 : vector<1x256xf32> to vector<8x256xf32>
    %49 = arith.mulf %47, %48 : vector<8x256xf32>
    %50 = arith.addf %44, %49 : vector<8x256xf32>
    %51 = vector.extract_strided_slice %2 {offsets = [0, 1], sizes = [8, 1], strides = [1, 1]} : vector<8x4xf32> to vector<8x1xf32>
    %52 = vector.extract_strided_slice %0 {offsets = [5, 0], sizes = [1, 256], strides = [1, 1]} : vector<8x256xf32> to vector<1x256xf32>
    %53 = vector.broadcast %51 : vector<8x1xf32> to vector<8x256xf32>
    %54 = vector.broadcast %52 : vector<1x256xf32> to vector<8x256xf32>
    %55 = arith.mulf %53, %54 : vector<8x256xf32>
    %56 = arith.addf %50, %55 : vector<8x256xf32>
    %57 = vector.extract_strided_slice %2 {offsets = [0, 2], sizes = [8, 1], strides = [1, 1]} : vector<8x4xf32> to vector<8x1xf32>
    %58 = vector.extract_strided_slice %0 {offsets = [6, 0], sizes = [1, 256], strides = [1, 1]} : vector<8x256xf32> to vector<1x256xf32>
    %59 = vector.broadcast %57 : vector<8x1xf32> to vector<8x256xf32>
    %60 = vector.broadcast %58 : vector<1x256xf32> to vector<8x256xf32>
    %61 = arith.mulf %59, %60 : vector<8x256xf32>
    %62 = arith.addf %56, %61 : vector<8x256xf32>
    %63 = vector.extract_strided_slice %2 {offsets = [0, 3], sizes = [8, 1], strides = [1, 1]} : vector<8x4xf32> to vector<8x1xf32>
    %64 = vector.extract_strided_slice %0 {offsets = [7, 0], sizes = [1, 256], strides = [1, 1]} : vector<8x256xf32> to vector<1x256xf32>
    %65 = vector.broadcast %63 : vector<8x1xf32> to vector<8x256xf32>
    %66 = vector.broadcast %64 : vector<1x256xf32> to vector<8x256xf32>
    %67 = arith.mulf %65, %66 : vector<8x256xf32>
    %68 = arith.addf %62, %67 : vector<8x256xf32>
    %cst_10 = arith.constant 8.000000e+00 : f32
    %69 = vector.broadcast %cst_10 : f32 to vector<8x256xf32>
    %70 = arith.mulf %68, %69 : vector<8x256xf32>
    %cst_11 = arith.constant 5.000000e-01 : f32
    %71 = vector.broadcast %cst_11 : f32 to vector<8x256xf32>
    %72 = arith.addf %70, %71 : vector<8x256xf32>
    %73 = math.floor %72 : vector<8x256xf32>
    %cst_12 = arith.constant -4.000000e+00 : f32
    %cst_13 = arith.constant 3.000000e+00 : f32
    %74 = vector.broadcast %cst_12 : f32 to vector<8x256xf32>
    %75 = arith.maximumf %74, %73 : vector<8x256xf32>
    %76 = vector.broadcast %cst_13 : f32 to vector<8x256xf32>
    %77 = arith.minimumf %76, %75 : vector<8x256xf32>
    %cst_14 = arith.constant dense<0.000000e+00> : vector<8xf32>
    %78 = vector.multi_reduction <add>, %77, %cst_14 [1] : vector<8x256xf32> to vector<8xf32>
    %79 = vector.shape_cast %78 : vector<8xf32> to vector<8x1xf32>
    %80 = vector.broadcast %79 : vector<8x1xf32> to vector<8x16xf32>
    %81 = arith.mulf %80, %3 : vector<8x16xf32>
    %cst_15 = arith.constant dense<0.000000e+00> : vector<16xf32>
    %82 = vector.multi_reduction <add>, %81, %cst_15 [0] : vector<8x16xf32> to vector<16xf32>
    %83 = vector.shape_cast %82 : vector<16xf32> to vector<1x16xf32>
    %84 = tpu.concatenate %43, %83 in 0 : vector<1x16xf32>, vector<1x16xf32> -> vector<2x16xf32>
    %c0_16 = arith.constant 0 : index
    %c0_17 = arith.constant 0 : index
    %85 = vector.load %arg2[%c0_16, %c0_17] : memref<2x16xf32, #tpu.memory_space<vmem>>, vector<2x16xf32>
    tpu.vector_store %arg2[%c0_16, %c0_17], %84 {strides = array<i32>} : memref<2x16xf32, #tpu.memory_space<vmem>>, vector<2x16xf32>,
    return
  }
}

</mosaic_0001>

<bundles_post_ra>
// kernel: forward.1
= control target key start
LH: loop header
LB: loop body
LE: loop exit
PB: predicated region body
PF: predicated region fallthrough
CT: control target
= control target key end

     0   :  { %v224_v1 = vmov 0   ;;  %v225_v2 = vmov 2   ;;  %s268_s0 = inlined_call_operand.vmem [shape: f32[8,256], index: 0, kind: input, shape index: {}]   ;;  %s269_s1 = inlined_call_operand.vmem [shape: f32[16,16], index: 1, kind: input, shape index: {}]   ;;  %s270_s2 = inlined_call_operand.hbm [shape: f32[2,16], index: 2, kind: output, shape index: {}]  }
   0x1   :  { %v14_v0 = vld [vmem:[%s269_s1] sm:$0xff]  ;;  %195 = vset.pattern.permute.xlu0 %v224_v1  ;;  %197 = vset.pattern.permute.xlu1 %v225_v2 }
   0x2   :  { %7 = vsyncpa [#allocation3], 0  ;;  %18 = vperm.xlu0 %195, %v14_v0   ;;  %50 = vperm.xlu1 %197, %v14_v0   ;;  %v226_v3 = vmov 1   ;;  %v227_v4 = vmov 3   ;;  %v21_v5 = vlaneseq  ;;  %v12_v9 = vld [vmem:[%s268_s0] sm:$0xff]  ;;  %v13_v10 = vld [vmem:[%s268_s0 + $0x8] sm:$0xff] }
   0x3   :  { %vm95_vm0 = vcmask 130048   ;;  %s228_s16 = smov [#allocation2]   ;;  %vm172_vm1 = vcmask 1040384   ;;  %vm174_vm2 = vcmask 123904  }
   0x4   :  { %v22_v6 = vshrl.u32 %v21_v5, 7  ;;  %s182_s17 = sshll.u32 %s228_s16, 4  ;;  %s183_s17 = int_to_ptr.vmem [resolvable:$true] %s182_s17 }
   0x5   :  { %p205_p1 = scmp.lt.s32.totalorder %s183_s17, %s183_s17 }
   0x6   :  { %196 = vset.pattern.permute.xlu0 %v226_v3  ;;  %198 = vset.pattern.permute.xlu1 %v227_v4  ;;  %v23_v7 = vsub.s32 0, %v22_v6  ;;  %v105_v8 = vsub.s32 4, %v22_v6  ;;  %v55_v11 = vsub.s32 2, %v22_v6  ;;  %v129_v12 = vsub.s32 6, %v22_v6 }
   0x7   :  { %34 = vperm.xlu0 %196, %v14_v0   ;;  %66 = vperm.xlu1 %198, %v14_v0   ;;  %v39_v13 = vsub.s32 1, %v22_v6  ;;  %v117_v14 = vsub.s32 5, %v22_v6  ;;  %v71_v15 = vsub.s32 3, %v22_v6  ;;  %v141_v16 = vsub.s32 7, %v22_v6 }
   0x8   :  { %v24_v18 = vrot.slane %v12_v9, %v23_v7  ;;  %v28_v19 = vrot.slane %v13_v10, %v23_v7  ;;  %v106_v20 = vrot.slane %v12_v9, %v105_v8  ;;  %v110_v21 = vrot.slane %v13_v10, %v105_v8 }
   0x9   :  { %v56_v23 = vrot.slane %v12_v9, %v55_v11  ;;  %v60_v24 = vrot.slane %v13_v10, %v55_v11  ;;  %v130_v25 = vrot.slane %v12_v9, %v129_v12  ;;  %v134_v26 = vrot.slane %v13_v10, %v129_v12 }
   0xa   :  { %v40_v27 = vrot.slane %v12_v9, %v39_v13  ;;  %v44_v28 = vrot.slane %v13_v10, %v39_v13  ;;  %v118_v29 = vrot.slane %v12_v9, %v117_v14  ;;  %v122_v30 = vrot.slane %v13_v10, %v117_v14 }
   0xb   :  { %199 = vset.pattern.permute.xlu0 %v227_v4  ;;  %v72_v31 = vrot.slane %v12_v9, %v71_v15  ;;  %v76_v32 = vrot.slane %v13_v10, %v71_v15  ;;  %v142_v33 = vrot.slane %v12_v9, %v141_v16  ;;  %v146_v34 = vrot.slane %v13_v10, %v141_v16 }
  0x81   :  { %v19_v17 = vpop.permute.xlu0 %18  ;;  %v51_v22 = vpop.permute.xlu1 %50 }
  0x82   :  { %v29_v35 = vmul.f32 %v24_v18, %v19_v17  ;;  %v30_v36 = vmul.f32 %v28_v19, %v19_v17  ;;  %v111_v37 = vmul.f32 %v106_v20, %v19_v17  ;;  %v112_v38 = vmul.f32 %v110_v21, %v19_v17 }
  0x83   :  { %v61_v39 = vmul.f32 %v56_v23, %v51_v22  ;;  %v62_v40 = vmul.f32 %v60_v24, %v51_v22  ;;  %v135_v41 = vmul.f32 %v130_v25, %v51_v22  ;;  %v136_v42 = vmul.f32 %v134_v26, %v51_v22  ;;  %v15_v23 = vld [vmem:[%s269_s1 + $0x8] sm:$0xff]  ;;  %s200_s1 = scalar_lea.vmem %s183_s17, 32 }
  0x84   :  { %p201_p0 = scmp.ne.s32.totalorder %s183_s17, %s200_s1  ;;  %p206_p2 = scmp.lt.s32.totalorder %s200_s1, %s200_s1 }
  0x86   :  { %v35_v43 = vpop.permute.xlu0 %34  ;;  %v67_v44 = vpop.permute.xlu1 %66  ;;  %p207_p3 = por %p206_p2, %p205_p1 }
  0x87   :  { %v45_v45 = vmul.f32 %v40_v27, %v35_v43  ;;  %v46_v46 = vmul.f32 %v44_v28, %v35_v43  ;;  %v123_v47 = vmul.f32 %v118_v29, %v35_v43  ;;  %v124_v48 = vmul.f32 %v122_v30, %v35_v43 }
  0x88   :  { %v77_v49 = vmul.f32 %v72_v31, %v67_v44  ;;  %v78_v50 = vmul.f32 %v76_v32, %v67_v44  ;;  %v147_v51 = vmul.f32 %v142_v33, %v67_v44  ;;  %v148_v52 = vmul.f32 %v146_v34, %v67_v44  ;;  %p208_p4 = pnand %p207_p3, %p201_p0 }
  0x89   :  { %v47_v53 = vadd.f32 %v45_v45, %v29_v35  ;;  %v48_v54 = vadd.f32 %v46_v46, %v30_v36  ;;  %v125_v55 = vadd.f32 %v123_v47, %v111_v37  ;;  %v126_v56 = vadd.f32 %v124_v48, %v112_v38 }
  0x8b   :  { %v137_v57 = vadd.f32 %v135_v41, %v125_v55  ;;  %v138_v58 = vadd.f32 %v136_v42, %v126_v56  ;;  %v63_v59 = vadd.f32 %v61_v39, %v47_v53  ;;  %v64_v60 = vadd.f32 %v62_v40, %v48_v54 }
  0x8d   :  { %v149_v61 = vadd.f32 %v147_v51, %v137_v57  ;;  %v150_v62 = vadd.f32 %v148_v52, %v138_v58  ;;  %v79_v63 = vadd.f32 %v77_v49, %v63_v59  ;;  %v80_v0 = vadd.f32 %v78_v50, %v64_v60 }
  0x8f   :  { %v151_v1 = vmul.f32 8.0, %v149_v61  ;;  %v152_v2 = vmul.f32 8.0, %v150_v62  ;;  %v81_v3 = vmul.f32 8.0, %v79_v63  ;;  %v82_v4 = vmul.f32 8.0, %v80_v0 }
  0x91   :  { %v153_v5 = vadd.f32 0.5, %v151_v1  ;;  %v154_v6 = vadd.f32 0.5, %v152_v2  ;;  %v83_v7 = vadd.f32 0.5, %v81_v3  ;;  %v84_v8 = vadd.f32 0.5, %v82_v4 }
  0x93   :  { %v155_v9 = vfloor.f32 %v153_v5  ;;  %v156_v10 = vfloor.f32 %v154_v6  ;;  %v85_v11 = vfloor.f32 %v83_v7  ;;  %v86_v12 = vfloor.f32 %v84_v8 }
  0x95   :  { %v157_v13 = vmax.f32 %v155_v9, -4.0  ;;  %v158_v14 = vmax.f32 %v156_v10, -4.0  ;;  %v87_v15 = vmax.f32 %v85_v11, -4.0  ;;  %v88_v16 = vmax.f32 %v86_v12, -4.0 }
  0x97   :  { %v159_v17 = vmin.f32 %v157_v13, 3.0  ;;  %v160_v18 = vmin.f32 %v158_v14, 3.0  ;;  %v89_v19 = vmin.f32 %v87_v15, 3.0  ;;  %v90_v20 = vmin.f32 %v88_v16, 3.0 }
  0x99   :  { %v161_v21 = vadd.f32 %v160_v18, %v159_v17  ;;  %v91_v22 = vadd.f32 %v90_v20, %v89_v19 }
  0x9b   :  { %162 = vadd.xlane.f32.xlu0 %v161_v21  ;;  %92 = vadd.xlane.f32.xlu1 %v91_v22 }
 0x128   :  { %v163_v24 = vpop.xlane.xlu0 %162  ;;  %v93_v25 = vpop.xlane.xlu1 %92 }
 0x129   :  { %v164_v26 = vmul.f32 %v163_v24, %v15_v23  ;;  %v94_v27 = vmul.f32 %v93_v25, %v15_v23 }
 0x12b   :  { %v165_v28 = vsel %vm95_vm0, %v164_v26, 0.0  ;;  %v96_v29 = vsel %vm95_vm0, %v94_v27, 0.0 }
 0x12c   :  { %v166_v30 = vrot.slane %v165_v28, 4  ;;  %v97_v31 = vrot.slane %v96_v29, 4 }
 0x12e   :  { %v167_v32 = vadd.f32 %v166_v30, %v165_v28  ;;  %v98_v33 = vadd.f32 %v97_v31, %v96_v29 }
 0x130   :  { %v168_v34 = vrot.slane %v167_v32, 2  ;;  %v99_v35 = vrot.slane %v98_v33, 2 }
 0x132   :  { %v169_v36 = vadd.f32 %v168_v34, %v167_v32  ;;  %v100_v37 = vadd.f32 %v99_v35, %v98_v33 }
 0x134   :  { %v170_v38 = vrot.slane %v169_v36, 1  ;;  %v101_v39 = vrot.slane %v100_v37, 1 }
 0x136   :  { %v102_v40 = vadd.f32 %v101_v39, %v100_v37  ;;  %v171_v41 = vadd.f32 %v170_v38, %v169_v36 }
 0x138   :  { %v173_v42 = vsel %vm172_vm1, %v102_v40, %v171_v41 }
 0x139   :  { %175 = vst.msk [vmem:[#allocation2] sm:$0x3] %vm174_vm2, %v173_v42 }
 0x13a   :  { %211 = shalt.err (!%p208_p4)
}
 0x13b   :  { %s212_s20 = scalar_lea.hbm %s270_s2, 32 }
 0x13c   :  { %p213_p5 = scmp.ne.s32.totalorder %s270_s2, %s212_s20  ;;  %p216_p6 = scmp.lt.u32.totalorder %s212_s20, %s270_s2 }
 0x13e   :  { %p218_p7 = pnand %p216_p6, %p213_p5 }
 0x140   :  { %221 = shalt.err (!%p218_p7)
}
 0x141   :  { %185 = dma.vmem_to_hbm [thread:$0]  %s183_s17, 32, %s270_s2, [#allocation3]  }
 0x142   :  { %222 = dma.done.wait [#allocation3], 32  }
 0x143   :  { %223 = vsyncadd [#allocation3], 4294967264 }
 0x144   :  { %189 = vsyncpa [#allocation3], 1 }

</bundles_post_ra>
